<compile_context>
chip_gen: v7x
topology: tpu7x:2x2x1
jax: 0.10.0
libtpu: 0.0.40
codegen_flags: <defaults>
</compile_context>

<pallas_src>
import math

import numpy as np

import jax
import jax.numpy as jnp
from jax.experimental import pallas as pl
from jax.experimental.pallas import tpu as pltpu

_LANE = 128
_TARGET_BLOCK_BYTES = 4 << 20     # ~4 MiB per buffer per grid step
_MIN_GRID_STEPS = 8               # allow megacore sharding on v7x (2 TCs)
_MIN_SPLIT_BLOCK_ROWS = 512       # never shrink blocks below this just to split
_SMALL_BYPASS_ELEMS = 1 << 16     # below this, plain XLA fusion wins


def _round_up(x, m):
    return ((x + m - 1) // m) * m


def _sublane_align(dtypes):
    """Native sublane multiple for the narrowest-packed dtype involved:
    f32 -> 8, bf16/f16 -> 16, int8/fp8 -> 32."""
    align = 8
    for dt in dtypes:
        itemsize = max(jnp.dtype(dt).itemsize, 1)
        align = max(align, 8 * max(1, 4 // itemsize))
    return align


def _vmem_capacity_bytes():
    """Per-core VMEM capacity; conservative default if the query is unavailable."""
    try:
        return int(pltpu.get_tpu_info().vmem_capacity_bytes)
    except Exception:
        return 64 << 20   # v7x per-TC VMEM (the smallest of the three generations)


def _nonscalar(a):
    try:
        return np.ndim(a) > 0
    except Exception:
        return False


def _probe_elementwise(fn, in_dtypes):
    """Return the output dtype if `fn` behaves elementwise on lane-dense tiles,
    else None.  Checks shape AND values: f(x)[rows/2] == f(x[rows/2]) and
    f(x)[:, :64] == f(x[:, :64]) -- reductions/normalizations fail this."""
    rows = 8
    try:
        probes = []
        for i, dt in enumerate(in_dtypes):
            base = (np.arange(rows * _LANE, dtype=np.float64) * (i + 1)) % 7.0 + 1.0
            probes.append(jnp.asarray(base.reshape(rows, _LANE)).astype(dt))
        full = fn(*probes)
        if tuple(full.shape) != (rows, _LANE):
            return None
        half_r = fn(*(p[: rows // 2] for p in probes))
        half_c = fn(*(p[:, : _LANE // 2] for p in probes))
        ok_r = bool(jnp.allclose(full[: rows // 2].astype(jnp.float32),
                                 half_r.astype(jnp.float32), atol=1e-5, rtol=1e-4))
        ok_c = bool(jnp.allclose(full[:, : _LANE // 2].astype(jnp.float32),
                                 half_c.astype(jnp.float32), atol=1e-5, rtol=1e-4))
        if not (ok_r and ok_c):
            return None
        return jnp.dtype(full.dtype)
    except Exception:
        return None


def _make_elementwise_kernel(fn, n_in):
    """Pallas kernel applying `fn` elementwise to n_in lane-dense input tiles."""
    def kernel(*refs):
        o_ref = refs[n_in]
        o_ref[...] = fn(*(r[...] for r in refs[:n_in])).astype(o_ref.dtype)
    return kernel


class Lambda:
    """JAX/Pallas port of zenkai's Lambda module: forward(*x) = f(*x, *args, **kwargs).

    Elementwise f runs through a tiled Pallas kernel; anything else (or tiny
    inputs) falls back to plain jax.jit(f) with identical semantics.
    """

    def __init__(self, f, *args, **kwargs):
        self._f = f
        self._args = args
        self._kwargs = kwargs
        self._cache = {}  # (shapes, dtypes) -> jitted forward

    # ------------------------------------------------------------------ build
    def _build(self, x_example):
        fn = lambda *vals: self._f(*vals, *self._args, **self._kwargs)
        jit_fallback = jax.jit(fn)

        # Pallas fast path requires equal input shapes (elementwise zip).
        shapes = {tuple(xi.shape) for xi in x_example}
        if len(shapes) != 1:
            return jit_fallback
        shape = tuple(x_example[0].shape)
        n = math.prod(shape) if shape else 1
        n_in = len(x_example)

        # Extra captured *args/**kwargs must be scalars: array-shaped extras
        # would be broadcast wrongly against the (rows, 128) tiles.
        extras = list(self._args) + list(self._kwargs.values())
        if any(_nonscalar(a) for a in extras):
            return jit_fallback

        # Tiny tensors: fixed pallas_call + reshape plumbing dominates.
        if n < _SMALL_BYPASS_ELEMS:
            return jit_fallback

        in_dtypes = [jnp.dtype(xi.dtype) for xi in x_example]
        out_dtype = _probe_elementwise(fn, in_dtypes)
        if out_dtype is None:
            return jit_fallback

        # ---------------------------------------------------------- tiling
        align = _sublane_align(in_dtypes + [out_dtype])
        rows_needed = max(pl.cdiv(n, _LANE), 1)
        rows = _round_up(rows_needed, align)       # minimal alignment padding
        padded = rows * _LANE
        needs_pad = padded != n

        itemsizes = [dt.itemsize for dt in in_dtypes] + [out_dtype.itemsize]
        bytes_per_row_all = _LANE * sum(itemsizes)  # one row across all buffers

        vmem_cap = _vmem_capacity_bytes()
        pipeline_budget = min(vmem_cap // 2, 96 << 20)

        rows_by_budget = max(pipeline_budget // (2 * bytes_per_row_all), align)
        rows_by_target = max(_TARGET_BLOCK_BYTES // (_LANE * max(itemsizes)), align)
        rows_by_split = max(pl.cdiv(rows, _MIN_GRID_STEPS), _MIN_SPLIT_BLOCK_ROWS)

        block_rows = min(rows_by_budget, rows_by_target, rows_by_split)
        block_rows = _round_up(max(block_rows, align), align)
        block_rows = min(block_rows, rows)          # rows is align-aligned already
        grid = (pl.cdiv(rows, block_rows),)         # last block may be partial

        # 2-deep pipeline for every in/out buffer (no extra 2x double-count).
        block_bytes = 2 * block_rows * bytes_per_row_all
        vmem_limit = int(min(max(block_bytes + (4 << 20), 16 << 20),
                             max(vmem_cap - (16 << 20), 32 << 20)))

        spec = pl.BlockSpec((block_rows, _LANE), lambda i: (i, 0))
        kernel = _make_elementwise_kernel(fn, n_in)

        call = pl.pallas_call(
            kernel,
            out_shape=jax.ShapeDtypeStruct((rows, _LANE), out_dtype),
            grid=grid,
            in_specs=[spec] * n_in,
            out_specs=spec,
            compiler_params=pltpu.CompilerParams(
                dimension_semantics=("parallel",),
                vmem_limit_bytes=vmem_limit),
        )

        def forward(*x):
            flat2d = []
            for xi in x:
                v = jnp.ravel(xi)                   # metadata-only under jit
                if needs_pad:
                    v = jnp.pad(v, (0, padded - n))
                flat2d.append(v.reshape(rows, _LANE))
            out2d = call(*flat2d)
            out_flat = out2d.reshape(-1)
            if needs_pad:
                out_flat = out_flat[:n]
            return out_flat.reshape(shape)

        # JIT the whole path so the (rare) pad/slice fuses around the kernel.
        return jax.jit(forward)

    # ------------------------------------------------------------------ call
    def __call__(self, *x):
        key = tuple((tuple(xi.shape), str(jnp.dtype(xi.dtype))) for xi in x)
        fwd = self._cache.get(key)
        if fwd is None:
            fwd = self._build(x)
            self._cache[key] = fwd
        return fwd(*x)


if __name__ == "__main__":
    key = jax.random.PRNGKey(0)
    k1, k2, k3 = jax.random.split(key, 3)

    # Small NCHW input consistent with typical module usage (bypass path).
    xs = jax.random.normal(k1, (2, 4, 16, 16), dtype=jnp.float32)
    # Moderately larger inputs that exercise the Pallas elementwise kernel.
    x = jax.random.normal(k2, (2, 4, 128, 128), dtype=jnp.float32)
    y = jax.random.normal(k3, (2, 4, 128, 128), dtype=jnp.float32)

    # Example 1: Lambda(f, scale) with an extra positional arg:
    # f(x, scale) = sigmoid(x) * scale   (Pallas path, f32, no padding).
    scaled_sigmoid = Lambda(lambda t, scale: jax.nn.sigmoid(t) * scale, 2.0)
    out1 = scaled_sigmoid(x)
    jax.block_until_ready(out1)
    ref1 = jax.nn.sigmoid(x) * 2.0
    assert out1.shape == x.shape and out1.dtype == x.dtype
    assert jnp.allclose(out1, ref1, atol=1e-6, rtol=1e-6)

    # Example 2: Lambda(add) with two tensor inputs (forward(*x), Pallas path).
    add_mod = Lambda(jnp.add)
    out2 = add_mod(x, y)
    jax.block_until_ready(out2)
    assert jnp.allclose(out2, x + y, atol=1e-6, rtol=1e-6)

    # Example 3: bf16 input exercises the dtype-aware (16-row) alignment path.
    xb = x.astype(jnp.bfloat16)
    relu_mod = Lambda(jax.nn.relu)
    out3 = relu_mod(xb)
    jax.block_until_ready(out3)
    assert out3.dtype == jnp.bfloat16
    assert jnp.allclose(out3.astype(jnp.float32),
                        jax.nn.relu(xb).astype(jnp.float32))

    # Example 4: tiny spec-shaped input hits the small-tensor XLA bypass.
    out4 = scaled_sigmoid(xs)
    jax.block_until_ready(out4)
    assert jnp.allclose(out4, jax.nn.sigmoid(xs) * 2.0, atol=1e-6, rtol=1e-6)

    # Example 5: non-elementwise f (softmax over last axis) is detected by the
    # value-level probe and falls back to plain XLA with correct semantics.
    softmax_mod = Lambda(jax.nn.softmax, axis=-1)
    out5 = softmax_mod(x)
    jax.block_until_ready(out5)
    assert jnp.allclose(out5, jax.nn.softmax(x, axis=-1), atol=1e-5, rtol=1e-5)

    # Cached / jitted second call on the same signature.
    out1b = scaled_sigmoid(x)
    jax.block_until_ready(out1b)
    assert jnp.allclose(out1b, ref1, atol=1e-6, rtol=1e-6)

    print("KERNEL_OK")
</pallas_src>

<mosaic_0001>
module attributes {stable_mosaic.version = 11 : i64} {
  func.func @kernel(%arg0: i32, %arg1: memref<512x128xf32, #tpu.memory_space<vmem>>, %arg2: memref<512x128xf32, #tpu.memory_space<vmem>>) attributes {dimension_semantics = [#tpu.dimension_semantics<parallel>], iteration_bounds = array<i64: 2>, scalar_prefetch = 0 : i64, scratch_operands = 0 : i64, tpu.core_type = #tpu.core_type<tc>, window_params = [{transform_indices = @transform_0, window_bounds = array<i64: 512, 128>}, {transform_indices = @transform_1, window_bounds = array<i64: 512, 128>}]} {
    %c0 = arith.constant 0 : index
    %c0_0 = arith.constant 0 : index
    %0 = vector.load %arg1[%c0, %c0_0] : memref<512x128xf32, #tpu.memory_space<vmem>>, vector<512x128xf32>
    %1 = arith.negf %0 : vector<512x128xf32>
    %2 = math.exp %1 : vector<512x128xf32>
    %cst = arith.constant 1.000000e+00 : f32
    %3 = vector.broadcast %cst : f32 to vector<512x128xf32>
    %4 = arith.addf %3, %2 : vector<512x128xf32>
    %5 = arith.divf %3, %4 : vector<512x128xf32>
    %cst_1 = arith.constant 2.000000e+00 : f32
    %6 = vector.broadcast %cst_1 : f32 to vector<512x128xf32>
    %7 = arith.mulf %5, %6 : vector<512x128xf32>
    %c0_2 = arith.constant 0 : index
    %c0_3 = arith.constant 0 : index
    %8 = vector.load %arg2[%c0_2, %c0_3] : memref<512x128xf32, #tpu.memory_space<vmem>>, vector<512x128xf32>
    tpu.vector_store %arg2[%c0_2, %c0_3], %7 {strides = array<i32>} : memref<512x128xf32, #tpu.memory_space<vmem>>, vector<512x128xf32>,
    return
  }
  func.func @transform_0(%arg0: i32) -> (i32, i32) {
    %c0_i32 = arith.constant 0 : i32
    %c0_i32_0 = arith.constant 0 : i32
    return %arg0, %c0_i32 : i32, i32
  }
  func.func @transform_1(%arg0: i32) -> (i32, i32) {
    %c0_i32 = arith.constant 0 : i32
    %c0_i32_0 = arith.constant 0 : i32
    return %arg0, %c0_i32 : i32, i32
  }
}

</mosaic_0001>

<bundles_post_ra>
// kernel: forward.1
= control target key start
LH: loop header
LB: loop body
LE: loop exit
PB: predicated region body
PF: predicated region fallthrough
CT: control target
= control target key end

     0   :  { %6 = vsyncpa [#allocation3], 0  ;;  %s1599_s0 = inlined_call_operand.hbm [shape: f32[1024,128], index: 0, kind: input, shape index: {}]   ;;  %s1600_s1 = inlined_call_operand.hbm [shape: f32[1024,128], index: 1, kind: output, shape index: {}]  }
   0x1   :  { %8 = vsyncpa [#allocation3 + $0x1], 0 }
   0x2   :  { %9 = vsyncpa [#allocation4], 0 }
   0x3   :  { %11 = vsyncpa [#allocation4 + $0x1], 0  ;;  %s1300_s6 = smov 0   ;;  %s1302_s7 = smov 0  }
   0x4   :  { %s1304_s8 = smov 0   ;;  %s1306_s9 = smov 0  }
   0x5 LB: > { %s1321_s10 = sadd.s32 4294967295, %s1282_s9   ;;  %s800_s11 = sadd.s32 4294967294, %s1282_s9   ;;  %s1282_s9 = sphi %s1306_s9, %s1613_s9   ;;  %s1278_s8 = sphi %s1304_s8, %s1612_s8   ;;  %s1274_s7 = sphi %s1302_s7, %s1611_s7   ;;  %s1270_s6 = sphi %s1300_s6, %s1610_s6  }
   0x6   : > { %s1325_s12 = sadd.s32 1, %s1282_s9   ;;  %s24_s13 = sadd.s32 1, %s1278_s8 }
   0x7   : > { %s21_s14 = ssub.s32 %s1282_s9, %s1325_s12  ;;  %p31_p0 = scmp.ne.s32.totalorder %s1278_s8, %s1274_s7 }
   0x8   : > { %p22_p1 = scmp.eq.s32.totalorder %s21_s14, 0  ;;  %p32_p2 = scmp.eq.s32.totalorder %s1282_s9, 0 }
   0x9   : > { %p37_p3 = scmp.ne.s32.totalorder %s1274_s7, %s1270_s6  ;;  %p38_p4 = scmp.eq.s32.totalorder %s1321_s10, 0 }
   0xa   : > { %s1337_s15 = scalar_select %p22_p1, %s1278_s8, %s24_s13  }
   0xb   : > { %p1339_p5 = por %p32_p2, %p31_p0  ;;  %p1343_p6 = por %p38_p4, %p37_p3 }
   0xc   : > { %p61_p7 = scmp.eq.s32.totalorder %s1321_s10, 1  ;;  %p67_p8 = scmp.eq.s32.totalorder %s800_s11, 1 }
   0xd   : > { %p892_p10 = scmp.lt.s32.totalorder %s1282_s9, 2  ;;  %s87_s20 = sand.u32 1, %s1278_s8  }
   0xe   : > { %p1350_p11 = por %p61_p7, %p31_p0  ;;  %p1354_p12 = por %p67_p8, %p37_p3 }
   0xf   : > { %s878_s21 = sshll.u32 %s1282_s9, 13  ;;  %s803_s22 = sshll.u32 %s87_s20, 9 }
  0x10   : > { %s1604_s18 = scalar_select %p1350_p11, 1, 0 }
  0x11   : > { %s1605_s19 = scalar_select %p1354_p12, 1, 0 }
  0x12   : > { %s1363_s25 = scalar_lea.hbm %s1599_s0, %s878_s21  ;;  %s91_s26 = scalar_lea.vmem [#allocation2], %s803_s22 }
  0x13   : > { %s98_s27 = sshll.u32 %s91_s26, 4  ;;  %p1367_p13 = pnand %p892_p10, %p1339_p5  ;;  %s1371_s27 = int_to_ptr.vmem [resolvable:$true] %s98_s27 }
  0x14   : > { %s1373_s29 = scalar_lea.sflag [#allocation3], %s87_s20  ;;  %s1186_s30 = scalar_lea.hbm %s1363_s25, 8192 }
  0x15   : > { %p1187_p0 = scmp.ne.s32.totalorder %s1363_s25, %s1186_s30  ;;  %p1188_p1 = pneg %p1367_p13 }
  0x16   : > { %s1191_s4 = scalar_lea.hbm %s1599_s0, 16384  ;;  %p1192_p4 = scmp.lt.u32.totalorder %s1363_s25, %s1599_s0 }
  0x17   : > { %p1189_p2 = pnand %p1188_p1, %p1187_p0  ;;  %p1193_p5 = scmp.lt.u32.totalorder %s1191_s4, %s1186_s30 }
  0x18   : > { %p1195_p8 = scmp.lt.u32.totalorder %s1186_s30, %s1363_s25 }
  0x19   : > { %p1190_p3 = pneg %p1189_p2  ;;  %p1194_p7 = por %p1193_p5, %p1192_p4 }
  0x1b   : > { %p1196_p10 = por %p1195_p8, %p1194_p7 }
  0x1d   : > { %p1197_p9 = pnand %p1196_p10, %p1190_p3 }
  0x1f   : > { %1200 = shalt.err (!%p1197_p9)
}
  0x20   : > { %s1201_s13 = scalar_lea.vmem %s1371_s27, 8192  ;;  %s1284_s14 = smov [#allocation2]  }
  0x21   : > { %p1202_p0 = scmp.ne.s32.totalorder %s1371_s27, %s1201_s13  ;;  %s1206_s16 = sshll.u32 %s1284_s14, 4  ;;  %s1207_s16 = int_to_ptr.vmem [resolvable:$false] %s1206_s16 }
  0x22   : > { %s1208_s20 = scalar_lea.vmem %s1207_s16, 16384  ;;  %p1209_p11 = scmp.lt.s32.totalorder %s1371_s27, %s1207_s16 }
  0x23   : > { %p1204_p2 = pnand %p1202_p0, %p1188_p1  ;;  %p1210_p4 = scmp.lt.s32.totalorder %s1208_s20, %s1201_s13 }
  0x25   : > { %p1205_p12 = pneg %p1204_p2  ;;  %p1211_p5 = por %p1210_p4, %p1209_p11 }
  0x27   : > { %p1212_p7 = pnand %p1211_p5, %p1205_p12 }
  0x29   : > { %1215 = shalt.err (!%p1212_p7)
}
  0x2a   : > { %s1285_s21 = smov 128   ;;  %s1286_s22 = smov 8  }
  0x2b   : > { %887 = dma.hbm_to_vmem [thread:$0]  (!%p1367_p13), %s1363_s25, 8192, %s1371_s27, %s1373_s29, %s1285_s21, %s1285_s21, %s1286_s22  }
  0x2c   : > { %p806_p9 = scmp.ge.s32.totalorder %s1282_s9, 1  ;;  %p106_p1 = scmp.lt.s32.totalorder %s1282_s9, 3 }
  0x2e   : > { %p107_p3 = pnand %p806_p9, %p106_p1 }
  0x2f   : > { %s1404_s23 = sand.u32 (!%p107_p3), 1, %s1274_s7  }
  0x30   : > { %110 = sbr.rel (%p107_p3) target bundleno = 215 (0xd7), region = 24  ;;  %s807_s24 = sshll.u32 (!%p107_p3), %s1404_s23, 9 }
  0x31   : > { %s113_s26 = scalar_lea.sflag (!%p107_p3), [#allocation3], %s1404_s23  ;;  %s1410_s30 = scalar_lea.vmem (!%p107_p3), [#allocation2], %s807_s24 }
  0x37   : > { %1261 = dma.done.wait (%p1343_p6), %s113_s26, 8192  }
  0x38   : > { %1263 = vsyncadd (%p1343_p6), %s113_s26, 4294959104  ;;  %v137_v0 = vld [vmem:[%s1410_s30] sm:$0xff]  ;;  %v138_v1 = vld [vmem:[%s1410_s30 + $0x8] sm:$0xff]  ;;  %s1438_s17 = scalar_lea.vmem [#allocation5], %s807_s24  ;;  %s879_s25 = sshll.u32 %s1321_s10, 13 }
  0x39   : > { %v139_v2 = vld [vmem:[%s1410_s30 + $0x10] sm:$0xff]  ;;  %v809_v3 = vmul.f32 -1.442695, %v137_v0  ;;  %v810_v4 = vmul.f32 -1.442695, %v138_v1  ;;  %v140_v6 = vld [vmem:[%s1410_s30 + $0x18] sm:$0xff]  ;;  %s1550_s2 = scalar_lea.hbm %s1600_s1, %s879_s25 }
  0x3a   : > { %v811_v5 = vmul.f32 -1.442695, %v139_v2  ;;  %v141_v7 = vld [vmem:[%s1410_s30 + $0x20] sm:$0xff]  ;;  %v142_v8 = vld [vmem:[%s1410_s30 + $0x28] sm:$0xff]  ;;  %v812_v9 = vmul.f32 -1.442695, %v140_v6 }
  0x3b   : > { %930 = vpow2.f32 %v809_v3  ;;  %v813_v10 = vmul.f32 -1.442695, %v141_v7  ;;  %v814_v11 = vmul.f32 -1.442695, %v142_v8  ;;  %v143_v12 = vld [vmem:[%s1410_s30 + $0x30] sm:$0xff]  ;;  %v144_v13 = vld [vmem:[%s1410_s30 + $0x38] sm:$0xff] }
  0x3c   : > { %932 = vpow2.f32 %v810_v4  ;;  %v145_v14 = vld [vmem:[%s1410_s30 + $0x40] sm:$0xff]  ;;  %v815_v15 = vmul.f32 -1.442695, %v143_v12  ;;  %v816_v16 = vmul.f32 -1.442695, %v144_v13  ;;  %v146_v17 = vld [vmem:[%s1410_s30 + $0x48] sm:$0xff] }
  0x3d   : > { %934 = vpow2.f32 %v811_v5  ;;  %v147_v18 = vld [vmem:[%s1410_s30 + $0x50] sm:$0xff]  ;;  %v817_v19 = vmul.f32 -1.442695, %v145_v14  ;;  %v148_v20 = vld [vmem:[%s1410_s30 + $0x58] sm:$0xff]  ;;  %v818_v21 = vmul.f32 -1.442695, %v146_v17 }
  0x3e   : > { %936 = vpow2.f32 %v812_v9  ;;  %v149_v22 = vld [vmem:[%s1410_s30 + $0x60] sm:$0xff]  ;;  %v819_v23 = vmul.f32 -1.442695, %v147_v18  ;;  %v820_v24 = vmul.f32 -1.442695, %v148_v20  ;;  %v150_v45 = vld [vmem:[%s1410_s30 + $0x68] sm:$0xff] }
  0x3f   : > { %938 = vpow2.f32 %v813_v10  ;;  %v821_v25 = vmul.f32 -1.442695, %v149_v22  ;;  %v151_v48 = vld [vmem:[%s1410_s30 + $0x70] sm:$0xff]  ;;  %v152_v51 = vld [vmem:[%s1410_s30 + $0x78] sm:$0xff]  ;;  %v822_v54 = vmul.f32 -1.442695, %v150_v45 }
  0x40   : > { %940 = vpow2.f32 %v814_v11  ;;  %v153_v55 = vld [vmem:[%s1410_s30 + $0x80] sm:$0xff]  ;;  %v823_v58 = vmul.f32 -1.442695, %v151_v48  ;;  %v154_v59 = vld [vmem:[%s1410_s30 + $0x88] sm:$0xff]  ;;  %v824_v62 = vmul.f32 -1.442695, %v152_v51 }
  0x41   : > { %942 = vpow2.f32 %v815_v15  ;;  %v155_v63 = vld [vmem:[%s1410_s30 + $0x90] sm:$0xff]  ;;  %v825_v2 = vmul.f32 -1.442695, %v153_v55  ;;  %v156_v3 = vld [vmem:[%s1410_s30 + $0x98] sm:$0xff]  ;;  %v826_v6 = vmul.f32 -1.442695, %v154_v59 }
  0x42   : > { %944 = vpow2.f32 %v816_v16  ;;  %v157_v7 = vld [vmem:[%s1410_s30 + $0xa0] sm:$0xff]  ;;  %v827_v10 = vmul.f32 -1.442695, %v155_v63  ;;  %v158_v11 = vld [vmem:[%s1410_s30 + $0xa8] sm:$0xff]  ;;  %v828_v14 = vmul.f32 -1.442695, %v156_v3 }
  0x43   : > { %946 = vpow2.f32 %v817_v19  ;;  %v159_v15 = vld [vmem:[%s1410_s30 + $0xb0] sm:$0xff]  ;;  %v829_v18 = vmul.f32 -1.442695, %v157_v7  ;;  %v160_v19 = vld [vmem:[%s1410_s30 + $0xb8] sm:$0xff]  ;;  %v830_v22 = vmul.f32 -1.442695, %v158_v11 }
  0x44   : > { %948 = vpow2.f32 %v818_v21  ;;  %v163_v59 = vld [vmem:[%s1410_s30 + $0xd0] sm:$0xff]  ;;  %s727_s27 = sshll.u32 %s1438_s17, 4  ;;  %s714_s10 = scalar_lea.sflag [#allocation4], %s1404_s23  ;;  %s1552_s27 = int_to_ptr.vmem [resolvable:$true] %s727_s27 }
  0x45   : > { %v931_v26 = vpop.eup %930  ;;  %950 = vpow2.f32 %v819_v23  ;;  %v161_v23 = vld [vmem:[%s1410_s30 + $0xc0] sm:$0xff]  ;;  %s1216_s3 = scalar_lea.vmem %s1552_s27, 8192  ;;  %p1607_p11 = scmp.ne.s32.totalorder %s1604_s18, 0 }
  0x46   : > { %v933_v27 = vpop.eup %932  ;;  %v393_v28 = vadd.f32 1.0, %v931_v26  ;;  %952 = vpow2.f32 %v820_v24  ;;  %v831_v26 = vmul.f32 -1.442695, %v159_v15  ;;  %p1217_p6 = scmp.ne.s32.totalorder %s1552_s27, %s1216_s3  ;;  %s1287_s4 = smov [#allocation5]  }
  0x47   : > { %v935_v29 = vpop.eup %934  ;;  %v394_v30 = vadd.f32 1.0, %v933_v27  ;;  %954 = vpow2.f32 %v821_v25  ;;  %v162_v27 = vld [vmem:[%s1410_s30 + $0xc8] sm:$0xff]  ;;  %s1220_s5 = sshll.u32 %s1287_s4, 4  ;;  %s1221_s5 = int_to_ptr.vmem [resolvable:$false] %s1220_s5 }
  0x48   : > { %v937_v31 = vpop.eup %936  ;;  %956 = vrcp.f32 %v393_v28  ;;  %v395_v32 = vadd.f32 1.0, %v935_v29  ;;  %p1218_p12 = pnand %p1217_p6, %p1607_p11  ;;  %s1222_s11 = scalar_lea.vmem %s1221_s5, 16384 }
  0x49   : > { %v939_v33 = vpop.eup %938  ;;  %958 = vrcp.f32 %v394_v30  ;;  %v396_v34 = vadd.f32 1.0, %v937_v31  ;;  %v832_v30 = vmul.f32 -1.442695, %v160_v19  ;;  %p1223_p8 = scmp.lt.s32.totalorder %s1552_s27, %s1221_s5  ;;  %p1224_p10 = scmp.lt.s32.totalorder %s1222_s11, %s1216_s3 }
  0x4a   : > { %v941_v35 = vpop.eup %940  ;;  %960 = vrcp.f32 %v395_v32  ;;  %v397_v36 = vadd.f32 1.0, %v939_v33  ;;  %v833_v33 = vmul.f32 -1.442695, %v161_v23  ;;  %p1219_p13 = pneg %p1218_p12 }
  0x4b   : > { %v943_v37 = vpop.eup %942  ;;  %962 = vrcp.f32 %v396_v34  ;;  %v398_v38 = vadd.f32 1.0, %v941_v35  ;;  %p1225_p0 = por %p1224_p10, %p1223_p8 }
  0x4c   : > { %v945_v39 = vpop.eup %944  ;;  %964 = vrcp.f32 %v397_v36  ;;  %v399_v40 = vadd.f32 1.0, %v943_v37  ;;  %v834_v36 = vmul.f32 -1.442695, %v162_v27 }
  0x4d   : > { %v947_v41 = vpop.eup %946  ;;  %966 = vrcp.f32 %v398_v38  ;;  %v400_v42 = vadd.f32 1.0, %v945_v39  ;;  %p1226_p2 = pnand %p1225_p0, %p1219_p13 }
  0x4e   : > { %v949_v43 = vpop.eup %948  ;;  %968 = vrcp.f32 %v399_v40  ;;  %v401_v44 = vadd.f32 1.0, %v947_v41 }
  0x4f   : > { %v951_v46 = vpop.eup %950  ;;  %970 = vrcp.f32 %v400_v42  ;;  %v402_v47 = vadd.f32 1.0, %v949_v43 }
  0x50   : > { %v953_v49 = vpop.eup %952  ;;  %972 = vrcp.f32 %v401_v44  ;;  %v403_v50 = vadd.f32 1.0, %v951_v46 }
  0x51   : > { %v955_v52 = vpop.eup %954  ;;  %974 = vrcp.f32 %v402_v47  ;;  %v404_v53 = vadd.f32 1.0, %v953_v49 }
  0x52   : > { %v957_v56 = vpop.eup %956  ;;  %976 = vrcp.f32 %v403_v50  ;;  %v405_v57 = vadd.f32 1.0, %v955_v52 }
  0x53   : > { %v959_v60 = vpop.eup %958  ;;  %v585_v61 = vmul.f32 2.0, %v957_v56  ;;  %978 = vrcp.f32 %v404_v53 }
  0x54   : > { %v961_v0 = vpop.eup %960  ;;  %v586_v1 = vmul.f32 2.0, %v959_v60  ;;  %980 = vrcp.f32 %v405_v57 }
  0x55   : > { %v963_v4 = vpop.eup %962  ;;  %649 = vst [vmem:[%s1438_s17] sm:$0xff] %v585_v61  ;;  %v587_v5 = vmul.f32 2.0, %v961_v0  ;;  %982 = vpow2.f32 %v822_v54 }
  0x56   : > { %v965_v8 = vpop.eup %964  ;;  %650 = vst [vmem:[%s1438_s17 + $0x8] sm:$0xff] %v586_v1  ;;  %v588_v9 = vmul.f32 2.0, %v963_v4  ;;  %984 = vpow2.f32 %v823_v58  ;;  %v165_v1 = vld [vmem:[%s1410_s30 + $0xe0] sm:$0xff]  ;;  %v835_v4 = vmul.f32 -1.442695, %v163_v59 }
  0x57   : > { %v967_v12 = vpop.eup %966  ;;  %651 = vst [vmem:[%s1438_s17 + $0x10] sm:$0xff] %v587_v5  ;;  %v589_v13 = vmul.f32 2.0, %v965_v8  ;;  %986 = vpow2.f32 %v824_v62  ;;  %v164_v62 = vld [vmem:[%s1410_s30 + $0xd8] sm:$0xff]  ;;  %v166_v5 = vld [vmem:[%s1410_s30 + $0xe8] sm:$0xff] }
  0x58   : > { %v969_v16 = vpop.eup %968  ;;  %652 = vst [vmem:[%s1438_s17 + $0x18] sm:$0xff] %v588_v9  ;;  %v590_v17 = vmul.f32 2.0, %v967_v12  ;;  %988 = vpow2.f32 %v825_v2  ;;  %v836_v8 = vmul.f32 -1.442695, %v164_v62  ;;  %v167_v9 = vld [vmem:[%s1410_s30 + $0xf0] sm:$0xff] }
  0x59   : > { %v971_v20 = vpop.eup %970  ;;  %653 = vst [vmem:[%s1438_s17 + $0x20] sm:$0xff] %v589_v13  ;;  %v591_v21 = vmul.f32 2.0, %v969_v16  ;;  %990 = vpow2.f32 %v826_v6  ;;  %v837_v12 = vmul.f32 -1.442695, %v165_v1  ;;  %v168_v13 = vld [vmem:[%s1410_s30 + $0xf8] sm:$0xff] }
  0x5a   : > { %v973_v24 = vpop.eup %972  ;;  %654 = vst [vmem:[%s1438_s17 + $0x28] sm:$0xff] %v590_v17  ;;  %v592_v25 = vmul.f32 2.0, %v971_v20  ;;  %992 = vpow2.f32 %v827_v10  ;;  %v838_v16 = vmul.f32 -1.442695, %v166_v5  ;;  %v169_v17 = vld [vmem:[%s1410_s30 + $0x100] sm:$0xff] }
  0x5b   : > { %v975_v28 = vpop.eup %974  ;;  %655 = vst [vmem:[%s1438_s17 + $0x30] sm:$0xff] %v591_v21  ;;  %v593_v29 = vmul.f32 2.0, %v973_v24  ;;  %994 = vpow2.f32 %v828_v14  ;;  %v839_v20 = vmul.f32 -1.442695, %v167_v9  ;;  %v170_v21 = vld [vmem:[%s1410_s30 + $0x108] sm:$0xff]  ;;  %v176_v9 = vld [vmem:[%s1410_s30 + $0x138] sm:$0xff] }
  0x5c   : > { %v977_v31 = vpop.eup %976  ;;  %656 = vst [vmem:[%s1438_s17 + $0x38] sm:$0xff] %v592_v25  ;;  %v594_v32 = vmul.f32 2.0, %v975_v28  ;;  %996 = vpow2.f32 %v829_v18  ;;  %v840_v24 = vmul.f32 -1.442695, %v168_v13  ;;  %v171_v25 = vld [vmem:[%s1410_s30 + $0x110] sm:$0xff] }
  0x5d   : > { %v979_v34 = vpop.eup %978  ;;  %657 = vst [vmem:[%s1438_s17 + $0x40] sm:$0xff] %v593_v29  ;;  %v595_v35 = vmul.f32 2.0, %v977_v31  ;;  %998 = vpow2.f32 %v830_v22  ;;  %v841_v28 = vmul.f32 -1.442695, %v169_v17  ;;  %v172_v29 = vld [vmem:[%s1410_s30 + $0x118] sm:$0xff] }
  0x5e   : > { %v981_v37 = vpop.eup %980  ;;  %658 = vst [vmem:[%s1438_s17 + $0x48] sm:$0xff] %v594_v32  ;;  %v596_v38 = vmul.f32 2.0, %v979_v34  ;;  %1000 = vpow2.f32 %v831_v26  ;;  %v842_v32 = vmul.f32 -1.442695, %v170_v21 }
  0x5f   : > { %v983_v39 = vpop.eup %982  ;;  %659 = vst [vmem:[%s1438_s17 + $0x50] sm:$0xff] %v595_v35  ;;  %v597_v40 = vmul.f32 2.0, %v981_v37  ;;  %1002 = vpow2.f32 %v832_v30  ;;  %v174_v37 = vld [vmem:[%s1410_s30 + $0x128] sm:$0xff] }
  0x60   : > { %v985_v41 = vpop.eup %984  ;;  %660 = vst [vmem:[%s1438_s17 + $0x58] sm:$0xff] %v596_v38  ;;  %v406_v42 = vadd.f32 1.0, %v983_v39  ;;  %1004 = vpow2.f32 %v833_v33  ;;  %v173_v33 = vld [vmem:[%s1410_s30 + $0x120] sm:$0xff] }
  0x61   : > { %v987_v43 = vpop.eup %986  ;;  %661 = vst [vmem:[%s1438_s17 + $0x60] sm:$0xff] %v597_v40  ;;  %v407_v44 = vadd.f32 1.0, %v985_v41  ;;  %1006 = vpow2.f32 %v834_v36  ;;  %v843_v36 = vmul.f32 -1.442695, %v171_v25  ;;  %v844_v40 = vmul.f32 -1.442695, %v172_v29 }
  0x62   : > { %v989_v45 = vpop.eup %988  ;;  %1008 = vrcp.f32 %v406_v42  ;;  %v408_v46 = vadd.f32 1.0, %v987_v43  ;;  %v175_v41 = vld [vmem:[%s1410_s30 + $0x130] sm:$0xff] }
  0x63   : > { %v991_v47 = vpop.eup %990  ;;  %1010 = vrcp.f32 %v407_v44  ;;  %v409_v48 = vadd.f32 1.0, %v989_v45  ;;  %v845_v44 = vmul.f32 -1.442695, %v173_v33 }
  0x64   : > { %v993_v49 = vpop.eup %992  ;;  %1012 = vrcp.f32 %v408_v46  ;;  %v410_v50 = vadd.f32 1.0, %v991_v47  ;;  %v846_v47 = vmul.f32 -1.442695, %v174_v37 }
  0x65   : > { %v995_v51 = vpop.eup %994  ;;  %1014 = vrcp.f32 %v409_v48  ;;  %v411_v52 = vadd.f32 1.0, %v993_v49 }
  0x66   : > { %v997_v53 = vpop.eup %996  ;;  %1016 = vrcp.f32 %v410_v50  ;;  %v412_v54 = vadd.f32 1.0, %v995_v51  ;;  %v847_v50 = vmul.f32 -1.442695, %v175_v41 }
  0x67   : > { %v999_v55 = vpop.eup %998  ;;  %1018 = vrcp.f32 %v411_v52  ;;  %v413_v56 = vadd.f32 1.0, %v997_v53 }
  0x68   : > { %v1001_v57 = vpop.eup %1000  ;;  %1020 = vrcp.f32 %v412_v54  ;;  %v414_v58 = vadd.f32 1.0, %v999_v55 }
  0x69   : > { %v1003_v60 = vpop.eup %1002  ;;  %1022 = vrcp.f32 %v413_v56  ;;  %v415_v61 = vadd.f32 1.0, %v1001_v57 }
  0x6a   : > { %v1005_v63 = vpop.eup %1004  ;;  %1024 = vrcp.f32 %v414_v58  ;;  %v416_v0 = vadd.f32 1.0, %v1003_v60 }
  0x6b   : > { %v1007_v2 = vpop.eup %1006  ;;  %1026 = vrcp.f32 %v415_v61  ;;  %v417_v3 = vadd.f32 1.0, %v1005_v63 }
  0x6c   : > { %v1009_v6 = vpop.eup %1008  ;;  %1028 = vrcp.f32 %v416_v0  ;;  %v418_v7 = vadd.f32 1.0, %v1007_v2 }
  0x6d   : > { %v1011_v10 = vpop.eup %1010  ;;  %v598_v11 = vmul.f32 2.0, %v1009_v6  ;;  %1030 = vrcp.f32 %v417_v3 }
  0x6e   : > { %v1013_v14 = vpop.eup %1012  ;;  %v599_v15 = vmul.f32 2.0, %v1011_v10  ;;  %1032 = vrcp.f32 %v418_v7 }
  0x6f   : > { %v1015_v18 = vpop.eup %1014  ;;  %662 = vst [vmem:[%s1438_s17 + $0x68] sm:$0xff] %v598_v11  ;;  %v600_v19 = vmul.f32 2.0, %v1013_v14  ;;  %1034 = vpow2.f32 %v835_v4 }
  0x70   : > { %v1017_v22 = vpop.eup %1016  ;;  %663 = vst [vmem:[%s1438_s17 + $0x70] sm:$0xff] %v599_v15  ;;  %v601_v23 = vmul.f32 2.0, %v1015_v18  ;;  %1036 = vpow2.f32 %v836_v8  ;;  %v178_v15 = vld [vmem:[%s1410_s30 + $0x148] sm:$0xff]  ;;  %v848_v18 = vmul.f32 -1.442695, %v176_v9 }
  0x71   : > { %v1019_v26 = vpop.eup %1018  ;;  %664 = vst [vmem:[%s1438_s17 + $0x78] sm:$0xff] %v600_v19  ;;  %v602_v27 = vmul.f32 2.0, %v1017_v22  ;;  %1038 = vpow2.f32 %v837_v12  ;;  %v177_v12 = vld [vmem:[%s1410_s30 + $0x140] sm:$0xff]  ;;  %v179_v19 = vld [vmem:[%s1410_s30 + $0x150] sm:$0xff] }
  0x72   : > { %v1021_v30 = vpop.eup %1020  ;;  %665 = vst [vmem:[%s1438_s17 + $0x80] sm:$0xff] %v601_v23  ;;  %v603_v31 = vmul.f32 2.0, %v1019_v26  ;;  %1040 = vpow2.f32 %v838_v16  ;;  %v849_v22 = vmul.f32 -1.442695, %v177_v12  ;;  %v180_v23 = vld [vmem:[%s1410_s30 + $0x158] sm:$0xff] }
  0x73   : > { %v1023_v34 = vpop.eup %1022  ;;  %666 = vst [vmem:[%s1438_s17 + $0x88] sm:$0xff] %v602_v27  ;;  %v604_v35 = vmul.f32 2.0, %v1021_v30  ;;  %1042 = vpow2.f32 %v839_v20  ;;  %v850_v26 = vmul.f32 -1.442695, %v178_v15  ;;  %v181_v27 = vld [vmem:[%s1410_s30 + $0x160] sm:$0xff] }
  0x74   : > { %v1025_v38 = vpop.eup %1024  ;;  %667 = vst [vmem:[%s1438_s17 + $0x90] sm:$0xff] %v603_v31  ;;  %v605_v39 = vmul.f32 2.0, %v1023_v34  ;;  %1044 = vpow2.f32 %v840_v24  ;;  %v851_v30 = vmul.f32 -1.442695, %v179_v19  ;;  %v182_v31 = vld [vmem:[%s1410_s30 + $0x168] sm:$0xff] }
  0x75   : > { %v1027_v42 = vpop.eup %1026  ;;  %668 = vst [vmem:[%s1438_s17 + $0x98] sm:$0xff] %v604_v35  ;;  %v606_v43 = vmul.f32 2.0, %v1025_v38  ;;  %1046 = vpow2.f32 %v841_v28  ;;  %v852_v34 = vmul.f32 -1.442695, %v180_v23  ;;  %v183_v35 = vld [vmem:[%s1410_s30 + $0x170] sm:$0xff]  ;;  %v189_v23 = vld [vmem:[%s1410_s30 + $0x1a0] sm:$0xff] }
  0x76   : > { %v1029_v45 = vpop.eup %1028  ;;  %669 = vst [vmem:[%s1438_s17 + $0xa0] sm:$0xff] %v605_v39  ;;  %v607_v46 = vmul.f32 2.0, %v1027_v42  ;;  %1048 = vpow2.f32 %v842_v32  ;;  %v853_v38 = vmul.f32 -1.442695, %v181_v27  ;;  %v184_v39 = vld [vmem:[%s1410_s30 + $0x178] sm:$0xff] }
  0x77   : > { %v1031_v48 = vpop.eup %1030  ;;  %670 = vst [vmem:[%s1438_s17 + $0xa8] sm:$0xff] %v606_v43  ;;  %v608_v49 = vmul.f32 2.0, %v1029_v45  ;;  %1050 = vpow2.f32 %v843_v36  ;;  %v854_v42 = vmul.f32 -1.442695, %v182_v31  ;;  %v185_v43 = vld [vmem:[%s1410_s30 + $0x180] sm:$0xff] }
  0x78   : > { %v1033_v51 = vpop.eup %1032  ;;  %671 = vst [vmem:[%s1438_s17 + $0xb0] sm:$0xff] %v607_v46  ;;  %v609_v52 = vmul.f32 2.0, %v1031_v48  ;;  %1052 = vpow2.f32 %v844_v40  ;;  %v855_v46 = vmul.f32 -1.442695, %v183_v35 }
  0x79   : > { %v1035_v53 = vpop.eup %1034  ;;  %672 = vst [vmem:[%s1438_s17 + $0xb8] sm:$0xff] %v608_v49  ;;  %v610_v54 = vmul.f32 2.0, %v1033_v51  ;;  %1054 = vpow2.f32 %v845_v44  ;;  %v187_v51 = vld [vmem:[%s1410_s30 + $0x190] sm:$0xff] }
  0x7a   : > { %v1037_v55 = vpop.eup %1036  ;;  %673 = vst [vmem:[%s1438_s17 + $0xc0] sm:$0xff] %v609_v52  ;;  %v419_v56 = vadd.f32 1.0, %v1035_v53  ;;  %1056 = vpow2.f32 %v846_v47  ;;  %v186_v47 = vld [vmem:[%s1410_s30 + $0x188] sm:$0xff] }
  0x7b   : > { %v1039_v57 = vpop.eup %1038  ;;  %674 = vst [vmem:[%s1438_s17 + $0xc8] sm:$0xff] %v610_v54  ;;  %v420_v58 = vadd.f32 1.0, %v1037_v55  ;;  %1058 = vpow2.f32 %v847_v50  ;;  %v856_v50 = vmul.f32 -1.442695, %v184_v39  ;;  %v857_v54 = vmul.f32 -1.442695, %v185_v43 }
  0x7c   : > { %v1041_v59 = vpop.eup %1040  ;;  %1060 = vrcp.f32 %v419_v56  ;;  %v421_v60 = vadd.f32 1.0, %v1039_v57  ;;  %v188_v55 = vld [vmem:[%s1410_s30 + $0x198] sm:$0xff] }
  0x7d   : > { %v1043_v61 = vpop.eup %1042  ;;  %1062 = vrcp.f32 %v420_v58  ;;  %v422_v62 = vadd.f32 1.0, %v1041_v59  ;;  %v858_v58 = vmul.f32 -1.442695, %v186_v47 }
  0x7e   : > { %v1045_v63 = vpop.eup %1044  ;;  %1064 = vrcp.f32 %v421_v60  ;;  %v423_v0 = vadd.f32 1.0, %v1043_v61  ;;  %v859_v61 = vmul.f32 -1.442695, %v187_v51 }
  0x7f   : > { %v1047_v1 = vpop.eup %1046  ;;  %1066 = vrcp.f32 %v422_v62  ;;  %v424_v2 = vadd.f32 1.0, %v1045_v63 }
  0x80   : > { %v1049_v3 = vpop.eup %1048  ;;  %1068 = vrcp.f32 %v423_v0  ;;  %v425_v4 = vadd.f32 1.0, %v1047_v1  ;;  %v860_v0 = vmul.f32 -1.442695, %v188_v55 }
  0x81   : > { %v1051_v5 = vpop.eup %1050  ;;  %1070 = vrcp.f32 %v424_v2  ;;  %v426_v6 = vadd.f32 1.0, %v1049_v3 }
  0x82   : > { %v1053_v7 = vpop.eup %1052  ;;  %1072 = vrcp.f32 %v425_v4  ;;  %v427_v8 = vadd.f32 1.0, %v1051_v5 }
  0x83   : > { %v1055_v10 = vpop.eup %1054  ;;  %1074 = vrcp.f32 %v426_v6  ;;  %v428_v11 = vadd.f32 1.0, %v1053_v7 }
  0x84   : > { %v1057_v13 = vpop.eup %1056  ;;  %1076 = vrcp.f32 %v427_v8  ;;  %v429_v14 = vadd.f32 1.0, %v1055_v10 }
  0x85   : > { %v1059_v16 = vpop.eup %1058  ;;  %1078 = vrcp.f32 %v428_v11  ;;  %v430_v17 = vadd.f32 1.0, %v1057_v13 }
  0x86   : > { %v1061_v20 = vpop.eup %1060  ;;  %1080 = vrcp.f32 %v429_v14  ;;  %v431_v21 = vadd.f32 1.0, %v1059_v16 }
  0x87   : > { %v1063_v24 = vpop.eup %1062  ;;  %v611_v25 = vmul.f32 2.0, %v1061_v20  ;;  %1082 = vrcp.f32 %v430_v17 }
  0x88   : > { %v1065_v28 = vpop.eup %1064  ;;  %v612_v29 = vmul.f32 2.0, %v1063_v24  ;;  %1084 = vrcp.f32 %v431_v21 }
  0x89   : > { %v1067_v32 = vpop.eup %1066  ;;  %675 = vst [vmem:[%s1438_s17 + $0xd0] sm:$0xff] %v611_v25  ;;  %v613_v33 = vmul.f32 2.0, %v1065_v28  ;;  %1086 = vpow2.f32 %v848_v18 }
  0x8a   : > { %v1069_v36 = vpop.eup %1068  ;;  %676 = vst [vmem:[%s1438_s17 + $0xd8] sm:$0xff] %v612_v29  ;;  %v614_v37 = vmul.f32 2.0, %v1067_v32  ;;  %1088 = vpow2.f32 %v849_v22  ;;  %v191_v29 = vld [vmem:[%s1410_s30 + $0x1b0] sm:$0xff]  ;;  %v861_v32 = vmul.f32 -1.442695, %v189_v23 }
  0x8b   : > { %v1071_v40 = vpop.eup %1070  ;;  %677 = vst [vmem:[%s1438_s17 + $0xe0] sm:$0xff] %v613_v33  ;;  %v615_v41 = vmul.f32 2.0, %v1069_v36  ;;  %1090 = vpow2.f32 %v850_v26  ;;  %v190_v26 = vld [vmem:[%s1410_s30 + $0x1a8] sm:$0xff]  ;;  %v192_v33 = vld [vmem:[%s1410_s30 + $0x1b8] sm:$0xff] }
  0x8c   : > { %v1073_v44 = vpop.eup %1072  ;;  %678 = vst [vmem:[%s1438_s17 + $0xe8] sm:$0xff] %v614_v37  ;;  %v616_v45 = vmul.f32 2.0, %v1071_v40  ;;  %1092 = vpow2.f32 %v851_v30  ;;  %v862_v36 = vmul.f32 -1.442695, %v190_v26  ;;  %v193_v37 = vld [vmem:[%s1410_s30 + $0x1c0] sm:$0xff] }
  0x8d   : > { %v1075_v48 = vpop.eup %1074  ;;  %679 = vst [vmem:[%s1438_s17 + $0xf0] sm:$0xff] %v615_v41  ;;  %v617_v49 = vmul.f32 2.0, %v1073_v44  ;;  %1094 = vpow2.f32 %v852_v34  ;;  %v863_v40 = vmul.f32 -1.442695, %v191_v29  ;;  %v194_v41 = vld [vmem:[%s1410_s30 + $0x1c8] sm:$0xff] }
  0x8e   : > { %v1077_v52 = vpop.eup %1076  ;;  %680 = vst [vmem:[%s1438_s17 + $0xf8] sm:$0xff] %v616_v45  ;;  %v618_v53 = vmul.f32 2.0, %v1075_v48  ;;  %1096 = vpow2.f32 %v853_v38  ;;  %v864_v44 = vmul.f32 -1.442695, %v192_v33  ;;  %v195_v45 = vld [vmem:[%s1410_s30 + $0x1d0] sm:$0xff] }
  0x8f   : > { %v1079_v56 = vpop.eup %1078  ;;  %681 = vst [vmem:[%s1438_s17 + $0x100] sm:$0xff] %v617_v49  ;;  %v619_v57 = vmul.f32 2.0, %v1077_v52  ;;  %1098 = vpow2.f32 %v854_v42  ;;  %v865_v48 = vmul.f32 -1.442695, %v193_v37  ;;  %v196_v49 = vld [vmem:[%s1410_s30 + $0x1d8] sm:$0xff] }
  0x90   : > { %v1081_v59 = vpop.eup %1080  ;;  %682 = vst [vmem:[%s1438_s17 + $0x108] sm:$0xff] %v618_v53  ;;  %v620_v60 = vmul.f32 2.0, %v1079_v56  ;;  %1100 = vpow2.f32 %v855_v46  ;;  %v866_v52 = vmul.f32 -1.442695, %v194_v41  ;;  %v197_v53 = vld [vmem:[%s1410_s30 + $0x1e0] sm:$0xff] }
  0x91   : > { %v1083_v62 = vpop.eup %1082  ;;  %683 = vst [vmem:[%s1438_s17 + $0x110] sm:$0xff] %v619_v57  ;;  %v621_v63 = vmul.f32 2.0, %v1081_v59  ;;  %1102 = vpow2.f32 %v856_v50  ;;  %v867_v56 = vmul.f32 -1.442695, %v195_v45  ;;  %v198_v57 = vld [vmem:[%s1410_s30 + $0x1e8] sm:$0xff] }
  0x92   : > { %v1085_v1 = vpop.eup %1084  ;;  %684 = vst [vmem:[%s1438_s17 + $0x118] sm:$0xff] %v620_v60  ;;  %v622_v2 = vmul.f32 2.0, %v1083_v62  ;;  %1104 = vpow2.f32 %v857_v54  ;;  %v868_v60 = vmul.f32 -1.442695, %v196_v49 }
  0x93   : > { %v1087_v3 = vpop.eup %1086  ;;  %685 = vst [vmem:[%s1438_s17 + $0x120] sm:$0xff] %v621_v63  ;;  %v623_v4 = vmul.f32 2.0, %v1085_v1  ;;  %1106 = vpow2.f32 %v858_v58  ;;  %v200_v1 = vld [vmem:[%s1410_s30 + $0x1f8] sm:$0xff] }
  0x94   : > { %v1089_v5 = vpop.eup %1088  ;;  %686 = vst [vmem:[%s1438_s17 + $0x128] sm:$0xff] %v622_v2  ;;  %v432_v6 = vadd.f32 1.0, %v1087_v3  ;;  %1108 = vpow2.f32 %v859_v61  ;;  %v199_v61 = vld [vmem:[%s1410_s30 + $0x1f0] sm:$0xff] }
  0x95   : > { %v1091_v7 = vpop.eup %1090  ;;  %687 = vst [vmem:[%s1438_s17 + $0x130] sm:$0xff] %v623_v4  ;;  %v433_v8 = vadd.f32 1.0, %v1089_v5  ;;  %1110 = vpow2.f32 %v860_v0  ;;  %v869_v0 = vmul.f32 -1.442695, %v197_v53  ;;  %v870_v4 = vmul.f32 -1.442695, %v198_v57 }
  0x96   : > { %v1093_v9 = vpop.eup %1092  ;;  %1112 = vrcp.f32 %v432_v6  ;;  %v434_v10 = vadd.f32 1.0, %v1091_v7  ;;  %v871_v7 = vmul.f32 -1.442695, %v199_v61 }
  0x97   : > { %v1095_v11 = vpop.eup %1094  ;;  %1114 = vrcp.f32 %v433_v8  ;;  %v435_v12 = vadd.f32 1.0, %v1093_v9 }
  0x98   : > { %v1097_v13 = vpop.eup %1096  ;;  %1116 = vrcp.f32 %v434_v10  ;;  %v436_v14 = vadd.f32 1.0, %v1095_v11  ;;  %v872_v10 = vmul.f32 -1.442695, %v200_v1 }
  0x99   : > { %v1099_v15 = vpop.eup %1098  ;;  %1118 = vrcp.f32 %v435_v12  ;;  %v437_v16 = vadd.f32 1.0, %v1097_v13 }
  0x9a   : > { %v1101_v17 = vpop.eup %1100  ;;  %1120 = vrcp.f32 %v436_v14  ;;  %v438_v18 = vadd.f32 1.0, %v1099_v15 }
  0x9b   : > { %v1103_v19 = vpop.eup %1102  ;;  %1122 = vrcp.f32 %v437_v16  ;;  %v439_v20 = vadd.f32 1.0, %v1101_v17 }
  0x9c   : > { %v1105_v21 = vpop.eup %1104  ;;  %1124 = vrcp.f32 %v438_v18  ;;  %v440_v22 = vadd.f32 1.0, %v1103_v19 }
  0x9d   : > { %v1107_v24 = vpop.eup %1106  ;;  %1126 = vrcp.f32 %v439_v20  ;;  %v441_v25 = vadd.f32 1.0, %v1105_v21 }
  0x9e   : > { %v1109_v27 = vpop.eup %1108  ;;  %1128 = vrcp.f32 %v440_v22  ;;  %v442_v28 = vadd.f32 1.0, %v1107_v24 }
  0x9f   : > { %v1111_v30 = vpop.eup %1110  ;;  %1130 = vrcp.f32 %v441_v25  ;;  %v443_v31 = vadd.f32 1.0, %v1109_v27 }
  0xa0   : > { %v1113_v34 = vpop.eup %1112  ;;  %1132 = vrcp.f32 %v442_v28  ;;  %v444_v35 = vadd.f32 1.0, %v1111_v30 }
  0xa1   : > { %v1115_v38 = vpop.eup %1114  ;;  %v624_v39 = vmul.f32 2.0, %v1113_v34  ;;  %1134 = vrcp.f32 %v443_v31 }
  0xa2   : > { %v1117_v42 = vpop.eup %1116  ;;  %v625_v43 = vmul.f32 2.0, %v1115_v38  ;;  %1136 = vrcp.f32 %v444_v35 }
  0xa3   : > { %v1119_v46 = vpop.eup %1118  ;;  %688 = vst [vmem:[%s1438_s17 + $0x138] sm:$0xff] %v624_v39  ;;  %v626_v47 = vmul.f32 2.0, %v1117_v42  ;;  %1138 = vpow2.f32 %v861_v32 }
  0xa4   : > { %v1121_v50 = vpop.eup %1120  ;;  %689 = vst [vmem:[%s1438_s17 + $0x140] sm:$0xff] %v625_v43  ;;  %v627_v51 = vmul.f32 2.0, %v1119_v46  ;;  %1140 = vpow2.f32 %v862_v36 }
  0xa5   : > { %v1123_v54 = vpop.eup %1122  ;;  %690 = vst [vmem:[%s1438_s17 + $0x148] sm:$0xff] %v626_v47  ;;  %v628_v55 = vmul.f32 2.0, %v1121_v50  ;;  %1142 = vpow2.f32 %v863_v40 }
  0xa6   : > { %v1125_v58 = vpop.eup %1124  ;;  %691 = vst [vmem:[%s1438_s17 + $0x150] sm:$0xff] %v627_v51  ;;  %v629_v59 = vmul.f32 2.0, %v1123_v54  ;;  %1144 = vpow2.f32 %v864_v44 }
  0xa7   : > { %v1127_v62 = vpop.eup %1126  ;;  %692 = vst [vmem:[%s1438_s17 + $0x158] sm:$0xff] %v628_v55  ;;  %v630_v63 = vmul.f32 2.0, %v1125_v58  ;;  %1146 = vpow2.f32 %v865_v48 }
  0xa8   : > { %v1129_v2 = vpop.eup %1128  ;;  %693 = vst [vmem:[%s1438_s17 + $0x160] sm:$0xff] %v629_v59  ;;  %v631_v3 = vmul.f32 2.0, %v1127_v62  ;;  %1148 = vpow2.f32 %v866_v52 }
  0xa9   : > { %v1131_v5 = vpop.eup %1130  ;;  %694 = vst [vmem:[%s1438_s17 + $0x168] sm:$0xff] %v630_v63  ;;  %v632_v6 = vmul.f32 2.0, %v1129_v2  ;;  %1150 = vpow2.f32 %v867_v56 }
  0xaa   : > { %v1133_v8 = vpop.eup %1132  ;;  %695 = vst [vmem:[%s1438_s17 + $0x170] sm:$0xff] %v631_v3  ;;  %v633_v9 = vmul.f32 2.0, %v1131_v5  ;;  %1152 = vpow2.f32 %v868_v60 }
  0xab   : > { %v1135_v11 = vpop.eup %1134  ;;  %696 = vst [vmem:[%s1438_s17 + $0x178] sm:$0xff] %v632_v6  ;;  %v634_v12 = vmul.f32 2.0, %v1133_v8  ;;  %1154 = vpow2.f32 %v869_v0 }
  0xac   : > { %v1137_v13 = vpop.eup %1136  ;;  %697 = vst [vmem:[%s1438_s17 + $0x180] sm:$0xff] %v633_v9  ;;  %v635_v14 = vmul.f32 2.0, %v1135_v11  ;;  %1156 = vpow2.f32 %v870_v4 }
  0xad   : > { %v1139_v15 = vpop.eup %1138  ;;  %698 = vst [vmem:[%s1438_s17 + $0x188] sm:$0xff] %v634_v12  ;;  %v636_v16 = vmul.f32 2.0, %v1137_v13  ;;  %1158 = vpow2.f32 %v871_v7 }
  0xae   : > { %v1141_v17 = vpop.eup %1140  ;;  %699 = vst [vmem:[%s1438_s17 + $0x190] sm:$0xff] %v635_v14  ;;  %v445_v18 = vadd.f32 1.0, %v1139_v15  ;;  %1160 = vpow2.f32 %v872_v10 }
  0xaf   : > { %v1143_v19 = vpop.eup %1142  ;;  %700 = vst [vmem:[%s1438_s17 + $0x198] sm:$0xff] %v636_v16  ;;  %v446_v20 = vadd.f32 1.0, %v1141_v17 }
  0xb0   : > { %v1145_v21 = vpop.eup %1144  ;;  %1162 = vrcp.f32 %v445_v18  ;;  %v447_v22 = vadd.f32 1.0, %v1143_v19 }
  0xb1   : > { %v1147_v23 = vpop.eup %1146  ;;  %1164 = vrcp.f32 %v446_v20  ;;  %v448_v24 = vadd.f32 1.0, %v1145_v21 }
  0xb2   : > { %v1149_v25 = vpop.eup %1148  ;;  %1166 = vrcp.f32 %v447_v22  ;;  %v449_v26 = vadd.f32 1.0, %v1147_v23 }
  0xb3   : > { %v1151_v27 = vpop.eup %1150  ;;  %1168 = vrcp.f32 %v448_v24  ;;  %v450_v28 = vadd.f32 1.0, %v1149_v25 }
  0xb4   : > { %v1153_v29 = vpop.eup %1152  ;;  %1170 = vrcp.f32 %v449_v26  ;;  %v451_v30 = vadd.f32 1.0, %v1151_v27 }
  0xb5   : > { %v1155_v31 = vpop.eup %1154  ;;  %1172 = vrcp.f32 %v450_v28  ;;  %v452_v32 = vadd.f32 1.0, %v1153_v29 }
  0xb6   : > { %v1157_v33 = vpop.eup %1156  ;;  %1174 = vrcp.f32 %v451_v30  ;;  %v453_v34 = vadd.f32 1.0, %v1155_v31 }
  0xb7   : > { %v1159_v35 = vpop.eup %1158  ;;  %1176 = vrcp.f32 %v452_v32  ;;  %v454_v36 = vadd.f32 1.0, %v1157_v33 }
  0xb8   : > { %v1161_v37 = vpop.eup %1160  ;;  %1178 = vrcp.f32 %v453_v34  ;;  %v455_v38 = vadd.f32 1.0, %v1159_v35 }
  0xb9   : > { %1180 = vrcp.f32 %v454_v36  ;;  %v456_v39 = vadd.f32 1.0, %v1161_v37 }
  0xba   : > { %v1163_v40 = vpop.eup %1162  ;;  %1182 = vrcp.f32 %v455_v38 }
  0xbb   : > { %v1165_v41 = vpop.eup %1164  ;;  %v637_v42 = vmul.f32 2.0, %v1163_v40  ;;  %1184 = vrcp.f32 %v456_v39 }
  0xbc   : > { %v1167_v43 = vpop.eup %1166  ;;  %v638_v44 = vmul.f32 2.0, %v1165_v41 }
  0xbd   : > { %v1169_v45 = vpop.eup %1168  ;;  %701 = vst [vmem:[%s1438_s17 + $0x1a0] sm:$0xff] %v637_v42  ;;  %v639_v46 = vmul.f32 2.0, %v1167_v43 }
  0xbe   : > { %v1171_v47 = vpop.eup %1170  ;;  %702 = vst [vmem:[%s1438_s17 + $0x1a8] sm:$0xff] %v638_v44  ;;  %v640_v48 = vmul.f32 2.0, %v1169_v45 }
  0xbf   : > { %v1173_v49 = vpop.eup %1172  ;;  %703 = vst [vmem:[%s1438_s17 + $0x1b0] sm:$0xff] %v639_v46  ;;  %v641_v50 = vmul.f32 2.0, %v1171_v47 }
  0xc0   : > { %v1175_v51 = vpop.eup %1174  ;;  %704 = vst [vmem:[%s1438_s17 + $0x1b8] sm:$0xff] %v640_v48  ;;  %v642_v52 = vmul.f32 2.0, %v1173_v49 }
  0xc1   : > { %v1177_v53 = vpop.eup %1176  ;;  %705 = vst [vmem:[%s1438_s17 + $0x1c0] sm:$0xff] %v641_v50  ;;  %v643_v54 = vmul.f32 2.0, %v1175_v51 }
  0xc2   : > { %v1179_v55 = vpop.eup %1178  ;;  %706 = vst [vmem:[%s1438_s17 + $0x1c8] sm:$0xff] %v642_v52  ;;  %v644_v56 = vmul.f32 2.0, %v1177_v53 }
  0xc3   : > { %v1181_v57 = vpop.eup %1180  ;;  %707 = vst [vmem:[%s1438_s17 + $0x1d0] sm:$0xff] %v643_v54  ;;  %v645_v58 = vmul.f32 2.0, %v1179_v55 }
  0xc4   : > { %v1183_v59 = vpop.eup %1182  ;;  %708 = vst [vmem:[%s1438_s17 + $0x1d8] sm:$0xff] %v644_v56  ;;  %v646_v60 = vmul.f32 2.0, %v1181_v57 }
  0xc5   : > { %v1185_v61 = vpop.eup %1184  ;;  %709 = vst [vmem:[%s1438_s17 + $0x1e0] sm:$0xff] %v645_v58  ;;  %v647_v62 = vmul.f32 2.0, %v1183_v59 }
  0xc6   : > { %710 = vst [vmem:[%s1438_s17 + $0x1e8] sm:$0xff] %v646_v60  ;;  %v648_v63 = vmul.f32 2.0, %v1185_v61 }
  0xc7   : > { %711 = vst [vmem:[%s1438_s17 + $0x1f0] sm:$0xff] %v647_v62 }
  0xc8   : > { %712 = vst [vmem:[%s1438_s17 + $0x1f8] sm:$0xff] %v648_v63 }
  0xc9   : > { %1229 = shalt.err (!%p1226_p2)
}
  0xca   : > { %s1230_s13 = scalar_lea.hbm %s1550_s2, 8192  ;;  %s1234_s20 = scalar_lea.hbm %s1600_s1, 16384 }
  0xcb   : > { %p1231_p4 = scmp.ne.s32.totalorder %s1550_s2, %s1230_s13  ;;  %p1235_p9 = scmp.lt.u32.totalorder %s1550_s2, %s1600_s1 }
  0xcc   : > { %p1236_p1 = scmp.lt.u32.totalorder %s1234_s20, %s1230_s13  ;;  %p1238_p6 = scmp.lt.u32.totalorder %s1230_s13, %s1550_s2 }
  0xcd   : > { %p1232_p5 = pnand %p1231_p4, %p1607_p11 }
  0xce   : > { %p1237_p3 = por %p1236_p1, %p1235_p9 }
  0xcf   : > { %p1233_p7 = pneg %p1232_p5 }
  0xd0   : > { %p1239_p12 = por %p1238_p6, %p1237_p3 }
  0xd2   : > { %p1240_p13 = pnand %p1239_p12, %p1233_p7 }
  0xd4   : > { %1243 = shalt.err (!%p1240_p13)
}
  0xd5   : > { %s1288_s24 = smov 128   ;;  %s1289_s26 = smov 8  }
  0xd6   : > { %882 = dma.vmem_to_hbm [thread:$0]  (%p1607_p11), %s1552_s27, 8192, %s1550_s2, %s714_s10, %s1288_s24, %s1288_s24, %s1289_s26  }
  0xd7 PF: > { %s742_s30 = sand.u32 1, %s1270_s6   ;;  %p1608_p8 = scmp.ne.s32.totalorder %s1605_s19, 0 }
  0xd8   : > { %p1609_p10 = scmp.ge.s32.totalorder %s1282_s9, 2  ;;  %s743_s17 = scalar_lea.sflag [#allocation4], %s742_s30 }
  0xda   : > { %p889_p0 = pnand %p1609_p10, %p1608_p8 }
  0xdc   : > { %1265 = dma.done.wait (!%p889_p0), %s743_s17, 8192  }
  0xdd   : > { %1267 = vsyncadd (!%p889_p0), %s743_s17, 4294959104  ;;  %p14_p2 = scmp.ge.s32.totalorder %s1325_s12, 4   ;;  %s1610_s6 = smov %s1274_s7 }
  0xde   : > { %s1611_s7 = smov %s1278_s8  ;;  %s1612_s8 = smov %s1337_s15 }
  0xdf   : > { %s1613_s9 = smov %s1325_s12  ;;  %16 = sbr.rel (!%p14_p2) target bundleno = 5 (0x5), region = 69 }
  0xe6   :  { %748 = vsyncpa [#allocation3], 1 }
  0xe7   :  { %750 = vsyncpa [#allocation3 + $0x1], 1 }
  0xe8   :  { %751 = vsyncpa [#allocation4], 1 }
  0xe9   :  { %753 = vsyncpa [#allocation4 + $0x1], 1 }

</bundles_post_ra>
